<compile_context>
chip_gen: v7x
topology: tpu7x:2x2x1
jax: 0.10.0
libtpu: 0.0.40
codegen_flags: <defaults>
</compile_context>

<pallas_src>
import jax
import jax.numpy as jnp
from jax.experimental import pallas as pl
from jax.experimental.pallas import tpu as pltpu


def _round_up(x, m):
    return ((x + m - 1) // m) * m


def decoder_kernel(u_ref, v_ref, w_all_ref, m_ref, o_ref):
    """One row tile: relu(((u @ W_all) * rep(v)) @ M)."""
    u = u_ref[...]                                        # (tp, D)
    v = v_ref[...]                                        # (tp, D)
    tp, d = u.shape
    kd = w_all_ref.shape[1]
    k = kd // d

    # Single lane-dense MXU matmul replacing K small per-basis matmuls.
    t = jnp.dot(u, w_all_ref[...],
                preferred_element_type=jnp.float32)       # (tp, K*D) f32

    # prod[p, k*D + e] = t[p, k*D + e] * v[p, e]  (broadcast, no concatenate).
    prod = (t.reshape(tp, k, d) * v[:, None, :].astype(t.dtype)).reshape(tp, kd)
    prod = prod.astype(m_ref.dtype)

    # Fused per-k reduction + classifier matmul; output stays at C lanes
    # (masked vst is far cheaper than writing 128-C zero columns to HBM).
    out = jnp.dot(prod, m_ref[...],
                  preferred_element_type=jnp.float32)     # (tp, C) f32
    o_ref[...] = jnp.maximum(out, 0.0).astype(o_ref.dtype)


def decoder_forward(user_inputs, item_inputs, user_indices, item_indices,
                    weight, weight_classifier, *, tile_p=512,
                    compute_dtype=jnp.bfloat16):
    """JAX wrapper: gather + weight folding (glue) + Pallas hot path."""
    # TODO(synk): fuse the row gathers into the kernel (scalar-prefetched
    # indices + in-kernel dynamic row gather or per-row DMA) to drop this
    # (P, D) HBM round trip; kept in plain JAX because Mosaic's in-kernel
    # gather support for table[idx] row gathers is not robust at these shapes.
    u = user_inputs[user_indices].astype(compute_dtype)    # (P, D)
    v = item_inputs[item_indices].astype(compute_dtype)    # (P, D)

    P, D = u.shape
    K = weight.shape[0]
    C = weight_classifier.shape[1]
    KD = K * D

    # W_all[d, k*D + e] = weight[k, d, e]   -> (D, K*D), lane-dense matmul RHS.
    w_all = jnp.transpose(weight, (1, 0, 2)).reshape(D, KD).astype(compute_dtype)
    # M[k*D + d, c] = W_cls[k, c]           -> (K*D, C), no lane padding.
    m = jnp.repeat(weight_classifier, D, axis=0).astype(compute_dtype)

    # Row tiling: large tiles for pipeline efficiency (sublane-aligned to 16 so
    # bf16 packing stays legal). Keep >= 2 parallel grid steps for large P so
    # v7x's two TensorCores both get work.
    sub = 16
    tile_p = _round_up(max(sub, tile_p), sub)
    if P > tile_p and P < 2 * tile_p:
        tile_p = _round_up(pl.cdiv(P, 2), sub)
    tile_p = min(tile_p, _round_up(P, sub))
    grid = pl.cdiv(P, tile_p)

    out = pl.pallas_call(
        decoder_kernel,
        out_shape=jax.ShapeDtypeStruct((P, C), jnp.float32),
        grid_spec=pltpu.PrefetchScalarGridSpec(
            num_scalar_prefetch=0,
            grid=(grid,),
            in_specs=[
                pl.BlockSpec((tile_p, D), lambda p: (p, 0)),   # u row tile
                pl.BlockSpec((tile_p, D), lambda p: (p, 0)),   # v row tile
                pl.BlockSpec((D, KD), lambda p: (0, 0)),       # folded basis weights (resident)
                pl.BlockSpec((KD, C), lambda p: (0, 0)),       # expanded classifier (resident)
            ],
            out_specs=pl.BlockSpec((tile_p, C), lambda p: (p, 0)),
        ),
        compiler_params=pltpu.CompilerParams(
            dimension_semantics=("parallel",)),
    )(u, v, w_all, m)

    return out


def _kaiming_uniform(key, shape, fan_in):
    # Deterministic synthetic init matching kaiming_uniform_'s distribution shape.
    gain = jnp.sqrt(2.0)
    bound = gain * jnp.sqrt(3.0 / fan_in)
    return jax.random.uniform(key, shape, jnp.float32, -bound, bound)


def _reference(u_in, v_in, u_idx, v_idx, W, Wc):
    u = u_in[u_idx]
    v = v_in[v_idx]
    basis = jnp.stack(
        [jnp.sum((u @ W[k]) * v, axis=1) for k in range(W.shape[0])], axis=1)
    return jnp.maximum(basis @ Wc, 0.0)


if __name__ == "__main__":
    # Small shapes consistent with the module's forward.
    num_users, num_items = 16, 16
    input_dim = 32          # D
    num_weights = 4         # K
    num_classes = 8         # C
    P = 16                  # number of (user, item) pairs

    key = jax.random.PRNGKey(0)
    k1, k2, k3, k4, k5, k6 = jax.random.split(key, 6)

    user_inputs = jax.random.normal(k1, (num_users, input_dim), jnp.float32)
    item_inputs = jax.random.normal(k2, (num_items, input_dim), jnp.float32)
    user_indices = jax.random.randint(k3, (P,), 0, num_users)
    item_indices = jax.random.randint(k4, (P,), 0, num_items)

    # Parameters (deterministic, kaiming-uniform-like).
    weight = _kaiming_uniform(k5, (num_weights, input_dim, input_dim),
                              fan_in=input_dim * input_dim)
    weight_classifier = _kaiming_uniform(k6, (num_weights, num_classes),
                                         fan_in=num_classes)

    ref = _reference(user_inputs, item_inputs, user_indices, item_indices,
                     weight, weight_classifier)

    # Exact f32 path (matches module semantics up to f32 reassociation).
    out_f32 = decoder_forward(user_inputs, item_inputs, user_indices,
                              item_indices, weight, weight_classifier,
                              compute_dtype=jnp.float32)
    out_f32 = jax.block_until_ready(out_f32)
    assert out_f32.shape == (P, num_classes)
    assert jnp.allclose(out_f32, ref, atol=1e-4, rtol=1e-4), \
        "f32 kernel mismatch vs reference"

    # Default bf16 transfer path (HBM-bound kernel -> halved input bytes);
    # MXU accumulation stays f32, so only bf16 rounding remains.
    out_bf16 = decoder_forward(user_inputs, item_inputs, user_indices,
                               item_indices, weight, weight_classifier)
    out_bf16 = jax.block_until_ready(out_bf16)
    assert out_bf16.shape == (P, num_classes)
    assert jnp.allclose(out_bf16, ref, atol=5e-2, rtol=5e-2), \
        "bf16 kernel mismatch vs reference"

    print("KERNEL_OK")
</pallas_src>

<mosaic_0001>
module attributes {stable_mosaic.version = 11 : i64} {
  func.func @decoder_kernel(%arg0: i32, %arg1: memref<16x32xf32, #tpu.memory_space<vmem>>, %arg2: memref<16x32xf32, #tpu.memory_space<vmem>>, %arg3: memref<32x128xf32, #tpu.memory_space<vmem>>, %arg4: memref<128x8xf32, #tpu.memory_space<vmem>>, %arg5: memref<16x8xf32, #tpu.memory_space<vmem>>) attributes {dimension_semantics = [#tpu.dimension_semantics<parallel>], iteration_bounds = array<i64: 1>, scalar_prefetch = 0 : i64, scratch_operands = 0 : i64, tpu.core_type = #tpu.core_type<tc>, window_params = [{transform_indices = @transform_0, window_bounds = array<i64: 16, 32>}, {transform_indices = @transform_1, window_bounds = array<i64: 16, 32>}, {pipeline_mode = #tpu.pipeline_mode<synchronous>, transform_indices = @transform_2, window_bounds = array<i64: 32, 128>}, {pipeline_mode = #tpu.pipeline_mode<synchronous>, transform_indices = @transform_3, window_bounds = array<i64: 128, 8>}, {transform_indices = @transform_4, window_bounds = array<i64: 16, 8>}]} {
    %c0 = arith.constant 0 : index
    %c0_0 = arith.constant 0 : index
    %0 = vector.load %arg1[%c0, %c0_0] : memref<16x32xf32, #tpu.memory_space<vmem>>, vector<16x32xf32>
    %c0_1 = arith.constant 0 : index
    %c0_2 = arith.constant 0 : index
    %1 = vector.load %arg2[%c0_1, %c0_2] : memref<16x32xf32, #tpu.memory_space<vmem>>, vector<16x32xf32>
    %c0_3 = arith.constant 0 : index
    %c0_4 = arith.constant 0 : index
    %2 = vector.load %arg3[%c0_3, %c0_4] : memref<32x128xf32, #tpu.memory_space<vmem>>, vector<32x128xf32>
    %cst = arith.constant dense<0.000000e+00> : vector<16x128xf32>
    %3 = tpu.matmul %0, %2, %cst {dimension_numbers = #tpu.dot_dimension_numbers<[1], [0], [0], [1], [0, 0, 1, 1], [], []>} : vector<16x32xf32>, vector<32x128xf32>, vector<16x128xf32> -> vector<16x128xf32>
    %4 = vector.shape_cast %3 : vector<16x128xf32> to vector<16x4x32xf32>
    %5 = vector.shape_cast %1 : vector<16x32xf32> to vector<16x1x32xf32>
    %6 = vector.broadcast %5 : vector<16x1x32xf32> to vector<16x4x32xf32>
    %7 = arith.mulf %4, %6 : vector<16x4x32xf32>
    %8 = vector.shape_cast %7 : vector<16x4x32xf32> to vector<16x128xf32>
    %c0_5 = arith.constant 0 : index
    %c0_6 = arith.constant 0 : index
    %9 = vector.load %arg4[%c0_5, %c0_6] : memref<128x8xf32, #tpu.memory_space<vmem>>, vector<128x8xf32>
    %cst_7 = arith.constant dense<0.000000e+00> : vector<16x8xf32>
    %10 = tpu.matmul %8, %9, %cst_7 {dimension_numbers = #tpu.dot_dimension_numbers<[1], [0], [0], [1], [0, 0, 1, 1], [], []>} : vector<16x128xf32>, vector<128x8xf32>, vector<16x8xf32> -> vector<16x8xf32>
    %cst_8 = arith.constant 0.000000e+00 : f32
    %11 = vector.broadcast %cst_8 : f32 to vector<16x8xf32>
    %12 = arith.maximumf %10, %11 : vector<16x8xf32>
    %c0_9 = arith.constant 0 : index
    %c0_10 = arith.constant 0 : index
    %13 = vector.load %arg5[%c0_9, %c0_10] : memref<16x8xf32, #tpu.memory_space<vmem>>, vector<16x8xf32>
    tpu.vector_store %arg5[%c0_9, %c0_10], %12 {strides = array<i32>} : memref<16x8xf32, #tpu.memory_space<vmem>>, vector<16x8xf32>,
    return
  }
  func.func @transform_0(%arg0: i32) -> (i32, i32) {
    %c0_i32 = arith.constant 0 : i32
    %c0_i32_0 = arith.constant 0 : i32
    return %arg0, %c0_i32 : i32, i32
  }
  func.func @transform_1(%arg0: i32) -> (i32, i32) {
    %c0_i32 = arith.constant 0 : i32
    %c0_i32_0 = arith.constant 0 : i32
    return %arg0, %c0_i32 : i32, i32
  }
  func.func @transform_2(%arg0: i32) -> (i32, i32) {
    %c0_i32 = arith.constant 0 : i32
    %c0_i32_0 = arith.constant 0 : i32
    %c0_i32_1 = arith.constant 0 : i32
    return %c0_i32, %c0_i32_0 : i32, i32
  }
  func.func @transform_3(%arg0: i32) -> (i32, i32) {
    %c0_i32 = arith.constant 0 : i32
    %c0_i32_0 = arith.constant 0 : i32
    %c0_i32_1 = arith.constant 0 : i32
    return %c0_i32, %c0_i32_0 : i32, i32
  }
  func.func @transform_4(%arg0: i32) -> (i32, i32) {
    %c0_i32 = arith.constant 0 : i32
    %c0_i32_0 = arith.constant 0 : i32
    return %arg0, %c0_i32 : i32, i32
  }
}

</mosaic_0001>

<bundles_post_ra>
// kernel: tpu_custom_call.1
= control target key start
LH: loop header
LB: loop body
LE: loop exit
PB: predicated region body
PF: predicated region fallthrough
CT: control target
= control target key end

     0   :  { %vm25_vm0 = vcmask 261120   ;;  %s864_s27 = smov 32   ;;  %s865_s28 = smov 64   ;;  %v132_v28 = vlaneseq  ;;  %v866_v29 = vmov 1966171168   ;;  %vm621_vm1 = vcmask 523264   ;;  %s1097_s2 = inlined_call_operand.vmem [shape: f32[32,128], index: 2, kind: input, shape index: {}]   ;;  %s1098_s0 = inlined_call_operand.vmem [shape: f32[16,32], index: 0, kind: input, shape index: {}]   ;;  %s1099_s3 = inlined_call_operand.vmem [shape: f32[128,8], index: 3, kind: input, shape index: {}]   ;;  %s1100_s1 = inlined_call_operand.vmem [shape: f32[16,32], index: 1, kind: input, shape index: {}]   ;;  %s1101_s4 = inlined_call_operand.vmem [shape: f32[16,8], index: 4, kind: output, shape index: {}]  }
   0x1   :  { %v21_v0 = vld [vmem:[%s1097_s2] sm:$0xff]  ;;  %v22_v1 = vld [vmem:[%s1097_s2 + $0x8] sm:$0xff]  ;;  %v23_v2 = vld [vmem:[%s1097_s2 + $0x10] sm:$0xff]  ;;  %v267_v30 = vunpack.c.l.s4 %v866_v29  ;;  %v867_v40 = vmov 1983009808   ;;  %vm624_vm2 = vcmask 785408  }
   0x2   :  { %v799_v3 = vpack.c.bf16 %v22_v1, %v21_v0  ;;  %v24_v4 = vld [vmem:[%s1097_s2 + $0x18] sm:$0xff]  ;;  %v17_v5 = vld [vmem:[%s1098_s0] sm:$0xff]  ;;  %v18_v7 = vld [vmem:[%s1098_s0 + $0x8] sm:$0xff]  ;;  %s863_s2 = smov 96   ;;  %v133_v31 = vshrl.u32 %v132_v28, 7  ;;  %v130_v41 = vunpack.c.l.s4 %v867_v40  ;;  %vm720_vm3 = vcmask 64512  }
   0x3   :  { %v803_v6 = vpack.c.bf16 %v24_v4, %v23_v2  ;;  %761 = vmatprep.mubr.msk.f32.mxu0 %vm25_vm0, %v17_v5  ;;  %v627_v10 = vld [vmem:[%s1099_s3] sm:$0xff]  ;;  %v628_v11 = vld [vmem:[%s1099_s3 + $0x8] sm:$0xff]  ;;  %v629_v12 = vld [vmem:[%s1099_s3 + $0x10] sm:$0xff]  ;;  %v268_v32 = vunpack.c.0.s8 %v267_v30  ;;  %v868_v44 = vmov 1934713408  }
   0x4   :  { %800 = vmatprep.subr.bf16.mxu0 %v799_v3  ;;  %v807_v13 = vpack.c.bf16 %v628_v11, %v627_v10  ;;  %v630_v14 = vld [vmem:[%s1099_s3 + $0x18] sm:$0xff]  ;;  %v631_v16 = vld [vmem:[%s1099_s3 + $0x20] sm:$0xff]  ;;  %v632_v17 = vld [vmem:[%s1099_s3 + $0x28] sm:$0xff]  ;;  %v162_v45 = vunpack.c.l.s4 %v868_v44  ;;  %v131_v50 = vunpack.c.0.s8 %v130_v41  ;;  %v983_v56 = vsub.s32 0, %v133_v31 }
   0x5   :  { %802 = vmatpush3.bf16.msra.mxu0 %v799_v3  ;;  %v811_v15 = vpack.c.bf16 %v630_v14, %v629_v12  ;;  %v815_v18 = vpack.c.bf16 %v632_v17, %v631_v16  ;;  %v633_v19 = vld [vmem:[%s1099_s3 + $0x30] sm:$0xff]  ;;  %v634_v20 = vld [vmem:[%s1099_s3 + $0x38] sm:$0xff]  ;;  %v635_v22 = vld [vmem:[%s1099_s3 + $0x40] sm:$0xff]  ;;  %v271_v34 = vsub.s32 %v268_v32, %v133_v31 }
   0x6   :  { %804 = vmatprep.subr.bf16.mxu0 %v803_v6  ;;  %808 = vmatprep.subr.bf16.mxu1 %v807_v13  ;;  %v819_v21 = vpack.c.bf16 %v634_v20, %v633_v19  ;;  %v636_v23 = vld [vmem:[%s1099_s3 + $0x48] sm:$0xff]  ;;  %v637_v25 = vld [vmem:[%s1099_s3 + $0x50] sm:$0xff]  ;;  %v638_v26 = vld [vmem:[%s1099_s3 + $0x58] sm:$0xff]  ;;  %v163_v53 = vunpack.c.0.s8 %v162_v45  ;;  %v991_v62 = vsub.s32 %v131_v50, %v133_v31 }
   0x7   :  { %810 = vmatpush3.bf16.msra.mxu1 %v807_v13  ;;  %v823_v24 = vpack.c.bf16 %v636_v23, %v635_v22  ;;  %v827_v27 = vpack.c.bf16 %v638_v26, %v637_v25  ;;  %v19_v33 = vld [vmem:[%s1100_s1] sm:$0xff]  ;;  %v20_v38 = vld [vmem:[%s1100_s1 + $0x8] sm:$0xff] }
   0x8   :  { %812 = vmatprep.subr.bf16.mxu1 %v811_v15  ;;  %v265_v35 = vcombine.high %v19_v33, %v19_v33  ;;  %v272_v36 = vrot.slane %v19_v33, %v271_v34  ;;  %v314_v42 = vcombine.high %v20_v38, %v20_v38  ;;  %v321_v43 = vrot.slane %v20_v38, %v271_v34 }
   0x9   :  { %806 = vmatpush3.bf16.msra.mxu0 %v803_v6  ;;  %v995_v1 = vsub.s32 %v163_v53, %v133_v31  ;;  %v869_v53 = vmov 0.0  }
   0xa   :  { %v279_v37 = vrot.slane %v265_v35, %v271_v34  ;;  %v280_v39 = vcombine.high %v272_v36, %v272_v36  ;;  %v973_v47 = vrot.slane %v272_v36, %v271_v34  ;;  %v328_v51 = vrot.slane %v314_v42, %v271_v34 }
   0xb   :  { %814 = vmatpush3.bf16.msra.mxu1 %v811_v15  ;;  %v329_v52 = vcombine.high %v321_v43, %v321_v43  ;;  %v989_v60 = vrot.slane %v321_v43, %v271_v34 }
   0xc   :  { %762 = vmatmul.mubr.msk.f32.vlgmr.msra.gmra.mrb[0].mxu0 %vm25_vm0, %v18_v7  ;;  %816 = vmatprep.subr.bf16.mxu1 %v815_v18  ;;  %v281_v46 = vcombine.high %v279_v37, %v279_v37  ;;  %v975_v48 = vrot.slane %v279_v37, %v271_v34  ;;  %v977_v49 = vrot.slane %v280_v39, %v271_v34 }
   0xd   :  { %v310_v55 = vcombine.high %v973_v47, %v973_v47  ;;  %v330_v63 = vcombine.high %v328_v51, %v328_v51  ;;  %v993_v0 = vrot.slane %v329_v52, %v271_v34  ;;  %v999_v3 = vrot.slane %v328_v51, %v271_v34 }
   0xe   :  { %v979_v54 = vrot.slane %v281_v46, %v271_v34  ;;  %v311_v58 = vcombine.high %v975_v48, %v975_v48  ;;  %v312_v59 = vcombine.high %v977_v49, %v977_v49  ;;  %v366_v4 = vrot.slane %v973_v47, %v983_v56 }
   0xf   :  { %818 = vmatpush3.bf16.msra.mxu1 %v815_v18  ;;  %v370_v5 = vrot.slane %v977_v49, %v983_v56  ;;  %v374_v6 = vrot.slane %v310_v55, %v983_v56  ;;  %v382_v7 = vrot.slane %v975_v48, %v983_v56  ;;  %v359_v14 = vcombine.high %v989_v60, %v989_v60 }
  0x10   :  { %820 = vmatprep.subr.bf16.mxu1 %v819_v21  ;;  %v313_v2 = vcombine.high %v979_v54, %v979_v54  ;;  %v378_v11 = vrot.slane %v312_v59, %v983_v56  ;;  %v386_v12 = vrot.slane %v979_v54, %v983_v56  ;;  %v390_v13 = vrot.slane %v311_v58, %v983_v56 }
  0x11   :  { %v1014_v18 = vrot.slane %v330_v63, %v271_v34  ;;  %v361_v19 = vcombine.high %v993_v0, %v993_v0  ;;  %v360_v23 = vcombine.high %v999_v3, %v999_v3  ;;  %v398_v26 = vrot.slane %v989_v60, %v983_v56 }
  0x12   :  { %v394_v20 = vrot.slane %v313_v2, %v983_v56  ;;  %v414_v31 = vrot.slane %v999_v3, %v983_v56 }
  0x13   :  { %822 = vmatpush3.bf16.msra.mxu1 %v819_v21  ;;  %v362_v34 = vcombine.high %v1014_v18, %v1014_v18  ;;  %v410_v35 = vrot.slane %v361_v19, %v983_v56  ;;  %v418_v41 = vrot.slane %v1014_v18, %v983_v56  ;;  %v422_v42 = vrot.slane %v360_v23, %v983_v56 }
  0x14   :  { %824 = vmatprep.subr.bf16.mxu1 %v823_v24 }
  0x17   :  { %826 = vmatpush3.bf16.msra.mxu1 %v823_v24 }
  0x18   :  { %828 = vmatprep.subr.bf16.mxu1 %v827_v27 }
  0x1b   :  { %830 = vmatpush3.bf16.msra.mxu1 %v827_v27  ;;  %v402_v27 = vrot.slane %v993_v0, %v983_v56 }
  0xdf   :  { %v915_v8 = vpop.f32.mrb[0].mxu0 }
  0xe0   :  { %111 = vrot.lane.b32.xlu1 %v915_v8, %s863_s2  ;;  %v919_v9 = vpop.f32.mrb[1].mxu0 }
  0xe1   :  { %109 = vrot.lane.b32.xlu0 %v919_v9, %s863_s2 }
  0xe4   :  { %121 = vrot.lane.b32.xlu1 %v919_v9, %s864_s27 }
  0xe5   :  { %115 = vrot.lane.b32.xlu0 %v919_v9, %s865_s28 }
  0xe8   :  { %123 = vrot.lane.b32.xlu1 %v915_v8, %s864_s27 }
  0xe9   :  { %117 = vrot.lane.b32.xlu0 %v915_v8, %s865_s28 }
 0x152   :  { %v112_v57 = vpop.permute.xlu1 %111 }
 0x153   :  { %v110_v61 = vpop.permute.xlu0 %109 }
 0x156   :  { %v122_v10 = vpop.permute.xlu1 %121 }
 0x157   :  { %v143_v15 = vcombine.low %v110_v61, %v122_v10  ;;  %v144_v16 = vcombine.high %v110_v61, %v122_v10  ;;  %v116_v17 = vpop.permute.xlu0 %115 }
 0x158   :  { %v127_v21 = vcombine.low %v919_v9, %v116_v17  ;;  %v128_v22 = vcombine.high %v919_v9, %v116_v17  ;;  %v406_v9 = vrot.slane %v359_v14, %v983_v56 }
 0x159   :  { %v151_v24 = vrot.slane %v143_v15, %v991_v62  ;;  %v158_v25 = vrot.slane %v144_v16, %v991_v62  ;;  %v426_v15 = vrot.slane %v362_v34, %v983_v56 }
 0x15a   :  { %v135_v28 = vrot.slane %v127_v21, %v991_v62  ;;  %v142_v29 = vrot.slane %v128_v22, %v991_v62  ;;  %v124_v30 = vpop.permute.xlu1 %123 }
 0x15b   :  { %v211_v32 = vcombine.low %v112_v57, %v124_v30  ;;  %v212_v33 = vcombine.high %v112_v57, %v124_v30  ;;  %v118_v36 = vpop.permute.xlu0 %117 }
 0x15c   :  { %v159_v37 = vcombine.low %v135_v28, %v151_v24  ;;  %v160_v38 = vcombine.high %v135_v28, %v151_v24  ;;  %v175_v39 = vcombine.low %v142_v29, %v158_v25  ;;  %v176_v40 = vcombine.high %v142_v29, %v158_v25 }
 0x15d   :  { %v195_v43 = vcombine.low %v915_v8, %v118_v36  ;;  %v196_v44 = vcombine.high %v915_v8, %v118_v36  ;;  %v219_v49 = vrot.slane %v211_v32, %v991_v62  ;;  %v226_v50 = vrot.slane %v212_v33, %v991_v62 }
 0x15e   :  { %v167_v45 = vrot.slane %v159_v37, %v995_v1  ;;  %v174_v46 = vrot.slane %v160_v38, %v995_v1  ;;  %v183_v47 = vrot.slane %v175_v39, %v995_v1  ;;  %v190_v48 = vrot.slane %v176_v40, %v995_v1 }
 0x15f   :  { %v203_v51 = vrot.slane %v195_v43, %v991_v62  ;;  %v210_v52 = vrot.slane %v196_v44, %v991_v62 }
 0x160   :  { %v191_v54 = vcombine.high %v167_v45, %v869_v53  ;;  %v192_v55 = vcombine.high %v174_v46, %v869_v53  ;;  %v193_v8 = vcombine.high %v183_v47, %v869_v53  ;;  %v194_v57 = vcombine.high %v190_v48, %v869_v53 }
 0x161   :  { %v443_v58 = vmul.f32 %v366_v4, %v167_v45  ;;  %v445_v59 = vmul.f32 %v374_v6, %v174_v46  ;;  %v447_v60 = vmul.f32 %v382_v7, %v183_v47  ;;  %v449_v61 = vmul.f32 %v390_v13, %v190_v48  ;;  %v642_v45 = vld [vmem:[%s1099_s3 + $0x78] sm:$0xff] }
 0x162   :  { %v444_v63 = vmul.f32 %v370_v5, %v191_v54  ;;  %v446_v2 = vmul.f32 %v378_v11, %v192_v55  ;;  %v448_v3 = vmul.f32 %v386_v12, %v193_v8  ;;  %v450_v10 = vmul.f32 %v394_v20, %v194_v57 }
 0x163   :  { %v459_v14 = vcombine.low %v443_v58, %v445_v59  ;;  %v227_v16 = vcombine.low %v203_v51, %v219_v49  ;;  %v228_v17 = vcombine.high %v203_v51, %v219_v49  ;;  %v243_v21 = vcombine.low %v210_v52, %v226_v50 }
 0x164   :  { %v467_v18 = vcombine.low %v444_v63, %v446_v2  ;;  %v483_v19 = vcombine.low %v448_v3, %v450_v10  ;;  %v244_v22 = vcombine.high %v210_v52, %v226_v50  ;;  %v475_v23 = vcombine.low %v447_v60, %v449_v61 }
 0x165   :  { %v235_v24 = vrot.slane %v227_v16, %v995_v1  ;;  %v242_v4 = vrot.slane %v228_v17, %v995_v1  ;;  %v466_v6 = vrot.slane %v459_v14, %v991_v62  ;;  %v251_v5 = vrot.slane %v243_v21, %v995_v1 }
 0x166   :  { %v258_v7 = vrot.slane %v244_v22, %v995_v1  ;;  %v474_v11 = vrot.slane %v467_v18, %v991_v62  ;;  %v490_v12 = vrot.slane %v483_v19, %v991_v62  ;;  %v482_v38 = vrot.slane %v475_v23, %v991_v62 }
 0x167   :  { %v259_v13 = vcombine.high %v235_v24, %v869_v53  ;;  %v260_v20 = vcombine.high %v242_v4, %v869_v53  ;;  %v451_v25 = vmul.f32 %v398_v26, %v235_v24  ;;  %v453_v28 = vmul.f32 %v406_v9, %v242_v4  ;;  %v639_v26 = vld [vmem:[%s1099_s3 + $0x60] sm:$0xff]  ;;  %v640_v9 = vld [vmem:[%s1099_s3 + $0x68] sm:$0xff] }
 0x168   :  { %v261_v29 = vcombine.high %v251_v5, %v869_v53  ;;  %v262_v30 = vcombine.high %v258_v7, %v869_v53  ;;  %v455_v32 = vmul.f32 %v414_v31, %v251_v5  ;;  %v457_v33 = vmul.f32 %v422_v42, %v258_v7 }
 0x169   :  { %v452_v34 = vmul.f32 %v402_v27, %v259_v13  ;;  %v454_v36 = vmul.f32 %v410_v35, %v260_v20  ;;  %v527_v37 = vcombine.low %v451_v25, %v453_v28  ;;  %v492_v42 = vcombine.high %v466_v6, %v474_v11 }
 0x16a   :  { %v456_v39 = vmul.f32 %v418_v41, %v261_v29  ;;  %v458_v40 = vmul.f32 %v426_v15, %v262_v30  ;;  %v543_v43 = vcombine.low %v455_v32, %v457_v33  ;;  %v508_v44 = vcombine.high %v482_v38, %v490_v12  ;;  %v641_v41 = vld [vmem:[%s1099_s3 + $0x70] sm:$0xff] }
 0x16b   :  { %v535_v31 = vcombine.low %v452_v34, %v454_v36  ;;  %v491_v56 = vcombine.low %v466_v6, %v474_v11  ;;  %v534_v27 = vrot.slane %v527_v37, %v991_v62  ;;  %v507_v35 = vcombine.low %v482_v38, %v490_v12 }
 0x16c   :  { %v551_v0 = vcombine.low %v456_v39, %v458_v40  ;;  %v831_v48 = vpack.c.bf16 %v640_v9, %v639_v26  ;;  %v835_v49 = vpack.c.bf16 %v642_v45, %v641_v41  ;;  %v550_v50 = vrot.slane %v543_v43, %v991_v62 }
 0x16d   :  { %v542_v46 = vrot.slane %v535_v31, %v991_v62  ;;  %v499_v47 = vrot.slane %v491_v56, %v995_v1  ;;  %v515_v52 = vrot.slane %v507_v35, %v995_v1  ;;  %v506_v53 = vrot.slane %v492_v42, %v995_v1 }
 0x16e   :  { %v558_v51 = vrot.slane %v551_v0, %v991_v62  ;;  %v522_v54 = vrot.slane %v508_v44, %v995_v1  ;;  %832 = vmatprep.subr.bf16.mxu1 %v831_v48 }
 0x16f   :  { %v560_v55 = vcombine.high %v534_v27, %v542_v46  ;;  %v559_v8 = vcombine.low %v534_v27, %v542_v46  ;;  %834 = vmatpush3.bf16.msra.mxu1 %v831_v48  ;;  %v523_v59 = vcombine.low %v499_v47, %v515_v52  ;;  %v524_v3 = vcombine.high %v499_v47, %v515_v52 }
 0x170   :  { %v576_v57 = vcombine.high %v550_v50, %v558_v51  ;;  %v575_v58 = vcombine.low %v550_v50, %v558_v51  ;;  %836 = vmatprep.subr.bf16.mxu1 %v835_v49  ;;  %v525_v2 = vcombine.low %v506_v53, %v522_v54  ;;  %v526_v10 = vcombine.high %v506_v53, %v522_v54 }
 0x171   :  { %v574_v60 = vrot.slane %v560_v55, %v995_v1  ;;  %v567_v61 = vrot.slane %v559_v8, %v995_v1 }
 0x172   :  { %v590_v62 = vrot.slane %v576_v57, %v995_v1  ;;  %v583_v63 = vrot.slane %v575_v58, %v995_v1 }
 0x173   :  { %838 = vmatpush3.bf16.msra.mxu1 %v835_v49 }
 0x174   :  { %v593_v14 = vcombine.low %v574_v60, %v590_v62  ;;  %v592_v15 = vcombine.high %v567_v61, %v583_v63  ;;  %v591_v16 = vcombine.low %v567_v61, %v583_v63  ;;  %v594_v17 = vcombine.high %v574_v60, %v590_v62 }
 0x176   :  { %v851_v18 = vpack.i.bf16 %v593_v14, %v525_v2  ;;  %v846_v19 = vpack.i.bf16 %v592_v15, %v524_v3  ;;  %v856_v21 = vpack.i.bf16 %v594_v17, %v526_v10 }
 0x178   :  { %852 = vrot.lane.b32.xlu1 %v851_v18, %s865_s28  ;;  %847 = vrot.lane.b32.xlu0 %v846_v19, %s864_s27 }
 0x17c   :  { %857 = vrot.lane.b32.xlu0 %v856_v21, %s863_s2 }
 0x1ea   :  { %v853_v22 = vpop.permute.xlu1 %852  ;;  %v848_v23 = vpop.permute.xlu0 %847 }
 0x1eb   :  { %v850_v1 = vunpack.i.h.bf16 %v848_v23  ;;  %v849_v24 = vunpack.i.l.bf16 %v848_v23  ;;  %v855_v4 = vunpack.i.h.bf16 %v853_v22  ;;  %v854_v6 = vunpack.i.l.bf16 %v853_v22 }
 0x1ed   :  { %v619_v5 = vsel %vm25_vm0, %v523_v59, %v849_v24  ;;  %v620_v7 = vsel %vm25_vm0, %v591_v16, %v850_v1 }
 0x1ee   :  { %v858_v11 = vpop.permute.xlu0 %857  ;;  %v622_v20 = vsel %vm621_vm1, %v619_v5, %v854_v6  ;;  %v623_v25 = vsel %vm621_vm1, %v620_v7, %v855_v4 }
 0x1ef   :  { %v860_v12 = vunpack.i.h.bf16 %v858_v11  ;;  %v859_v13 = vunpack.i.l.bf16 %v858_v11 }
 0x1f1   :  { %v625_v28 = vsel %vm624_vm2, %v622_v20, %v859_v13  ;;  %v626_v29 = vsel %vm624_vm2, %v623_v25, %v860_v12 }
 0x1f2   :  { %796 = vmatprep.mubr.f32.mxu1 %v625_v28 }
 0x1f3   :  { %797 = vmatmul.mubr.f32.vlgmr.msra.gmra.mrb[0].mxu1 %v626_v29 }
 0x2c6   :  { %v798_v30 = vpop.f32.mrb[0].mxu1 }
 0x2c7   :  { %v719_v32 = vmax.f32 %v798_v30, 0.0  ;;  %v709_v33 = vpop.f32.mrb[1].mxu1 }
 0x2c8   :  { %v718_v34 = vmax.f32 %v709_v33, 0.0 }
 0x2c9   :  { %722 = vst.msk [vmem:[%s1101_s4 + $0x8] sm:$0xff] %vm720_vm3, %v719_v32 }
 0x2ca   :  { %721 = vst.msk [vmem:[%s1101_s4] sm:$0xff] %vm720_vm3, %v718_v34 }

</bundles_post_ra>
